<compile_context>
chip_gen: v6e
topology: v6e:2x2x1
jax: 0.10.0
libtpu: 0.0.40
codegen_flags: <defaults>
</compile_context>

<pallas_src>
import jax
import jax.numpy as jnp
from jax import lax
from jax.experimental import pallas as pl
from jax.experimental.pallas import tpu as pltpu


def binrot_kernel(feat_ref, ind_ref, side_ref, out_ref, pred_acc):
    """Per-batch-tile partial sums of the bin-rotation loss.

    Grid: (B // Bt, num_hw_chunks); chunk axis is the reduction ("arbitrary").

    feat_ref : (Bt, 8, T)  feature-map chunk, NCHW flattened (f32)
    ind_ref  : (Bt, 1, K)  int32 gather indices into [0, HW)
    side_ref : (Bt, 8, K)  f32 rows [mask, tb1, tb2, sin1, cos1, sin2, cos2, 0]
    out_ref  : (Bt, 6, 1)  f32 partial sums [ce1, ce2, s1, c1, s2, c2]
    pred_acc : (Bt, 8, K)  f32 VMEM scratch accumulating the gathered pred
    """
    ci = pl.program_id(1)
    t = feat_ref.shape[2]

    @pl.when(ci == 0)
    def _():
        pred_acc[...] = jnp.zeros_like(pred_acc)

    feat = feat_ref[...].astype(jnp.float32)                   # (Bt, 8, T)
    ind = ind_ref[...]                                         # (Bt, 1, K)

    # Global positions of this chunk as a (T, 1) column; the broadcasted
    # compare against ind is the only HW*K-wide VPU op.
    pos = lax.broadcasted_iota(jnp.int32, (t, 1), 0) + ci * t  # (T, 1)
    onehot = (pos[None, :, :] == ind).astype(jnp.float32)      # (Bt, T, K)

    # Fused transpose + gather: one-hot matmul on the MXU yields the gathered
    # rows lane-dense (8 sublanes x K lanes), accumulated across HW chunks.
    pred_acc[...] += jnp.einsum('bct,btk->bck', feat, onehot,
                                preferred_element_type=jnp.float32)

    @pl.when(ci == pl.num_programs(1) - 1)
    def _():
        pred = pred_acc[...]                                   # (Bt, 8, K)
        side = side_ref[...]                                   # (Bt, 8, K)
        m = side[:, 0:1, :]
        tb1 = side[:, 1:2, :]
        tb2 = side[:, 2:3, :]

        def bin_ce(z0, z1, tgt):
            # 2-class cross-entropy of mask-multiplied logits, target in {0,1}.
            z0 = z0 * m
            z1 = z1 * m
            zmax = jnp.maximum(z0, z1)
            lse = zmax + jnp.log(jnp.exp(z0 - zmax) + jnp.exp(z1 - zmax))
            sel = jnp.where(tgt != 0.0, z1, z0)
            return lse - sel                                   # (Bt, 1, K)

        def smooth_l1(x, y, valid):
            d = jnp.abs(x - y)
            l = jnp.where(d < 1.0, 0.5 * d * d, d - 0.5)
            return jnp.where(valid != 0.0, l, 0.0)             # only rows in this bin

        ce1 = bin_ce(pred[:, 0:1, :], pred[:, 1:2, :], tb1)
        ce2 = bin_ce(pred[:, 4:5, :], pred[:, 5:6, :], tb2)
        s1 = smooth_l1(pred[:, 2:3, :], side[:, 3:4, :], tb1)
        c1 = smooth_l1(pred[:, 3:4, :], side[:, 4:5, :], tb1)
        s2 = smooth_l1(pred[:, 6:7, :], side[:, 5:6, :], tb2)
        c2 = smooth_l1(pred[:, 7:8, :], side[:, 6:7, :], tb2)

        # Direct cross-lane reductions straight into the output rows (no
        # concatenate/relayout); written once per batch tile.
        out_ref[:, 0:1, :] = jnp.sum(ce1, axis=2, keepdims=True)
        out_ref[:, 1:2, :] = jnp.sum(ce2, axis=2, keepdims=True)
        out_ref[:, 2:3, :] = jnp.sum(s1, axis=2, keepdims=True)
        out_ref[:, 3:4, :] = jnp.sum(c1, axis=2, keepdims=True)
        out_ref[:, 4:5, :] = jnp.sum(s2, axis=2, keepdims=True)
        out_ref[:, 5:6, :] = jnp.sum(c2, axis=2, keepdims=True)


def _choose_tiles(B, HW, K, chunk_cap=2048, batch_bytes_target=1 << 20):
    """Pick (Bt, T): HW chunk size (multiple of 128 dividing HW, or full HW)
    and batch-tile size (divisor of B sized for ~1 MiB of feat per step)."""
    if HW <= chunk_cap:
        T = HW
    else:
        T = 0
        for t in range(chunk_cap - chunk_cap % 128, 0, -128):
            if HW % t == 0:
                T = t
                break
        if T == 0:
            # No 128-multiple divisor: fall back to a single full-extent chunk
            # (always a legal block shape).
            T = HW
    per_b_bytes = 8 * T * 4 + T * K * 4 + 8 * K * 4
    bt = max(1, min(B, batch_bytes_target // max(per_b_bytes, 1)))
    while B % bt != 0:
        bt -= 1
    return bt, T


def bin_rot_loss(output_nchw, mask, ind, rotbin, rotres):
    """output_nchw: [B,8,H,W]; mask: [B,K]; ind: [B,K] int; rotbin/rotres: [B,K,2]."""
    B, C, H, W = output_nchw.shape
    assert C == 8, "BinRotLoss expects 8 rotation channels"
    K = ind.shape[1]
    HW = H * W
    Bt, T = _choose_tiles(B, HW, K)

    feat = output_nchw.reshape(B, C, HW)                       # free reshape, no transpose
    ind3 = ind.astype(jnp.int32).reshape(B, 1, K)

    # TODO(synk): Mosaic has no sin/cos primitive, so the (tiny, O(B*K)) sin/cos
    # of rotres is precomputed here and packed with mask/rotbin into a single
    # (B, 8, K) side input (one DMA descriptor per grid step instead of three).
    rb = rotbin.astype(jnp.float32)
    side = jnp.stack(
        [mask.astype(jnp.float32),
         rb[..., 0], rb[..., 1],
         jnp.sin(rotres[..., 0]), jnp.cos(rotres[..., 0]),
         jnp.sin(rotres[..., 1]), jnp.cos(rotres[..., 1]),
         jnp.zeros((B, K), jnp.float32)],
        axis=1).astype(jnp.float32)                            # (B, 8, K)

    partials = pl.pallas_call(
        binrot_kernel,
        out_shape=jax.ShapeDtypeStruct((B, 6, 1), jnp.float32),
        grid=(B // Bt, HW // T),
        in_specs=[
            pl.BlockSpec((Bt, C, T), lambda b, c: (b, 0, c)),
            pl.BlockSpec((Bt, 1, K), lambda b, c: (b, 0, 0)),
            pl.BlockSpec((Bt, 8, K), lambda b, c: (b, 0, 0)),
        ],
        out_specs=pl.BlockSpec((Bt, 6, 1), lambda b, c: (b, 0, 0)),
        scratch_shapes=[pltpu.VMEM((Bt, 8, K), jnp.float32)],
        compiler_params=pltpu.CompilerParams(
            dimension_semantics=("parallel", "arbitrary")),
    )(feat, ind3, side)

    # Scalar epilogue: denominators need only rotbin, not the gathered data.
    p = jnp.sum(partials[:, :, 0], axis=0)                     # (6,) component sums
    n_total = jnp.float32(B * K)
    n1 = jnp.sum(rotbin[..., 0] != 0).astype(jnp.float32)
    n2 = jnp.sum(rotbin[..., 1] != 0).astype(jnp.float32)

    loss_bin1 = p[0] / n_total
    loss_bin2 = p[1] / n_total
    # Matches the PyTorch module: residual terms are added only when the bin
    # has at least one valid row (otherwise contribute 0).
    res1 = jnp.where(n1 > 0, (p[2] + p[3]) / jnp.maximum(n1, 1.0), 0.0)
    res2 = jnp.where(n2 > 0, (p[4] + p[5]) / jnp.maximum(n2, 1.0), 0.0)
    return loss_bin1 + loss_bin2 + res1 + res2


def bin_rot_loss_ref(output_nchw, mask, ind, rotbin, rotres):
    """Pure-JAX reference matching the PyTorch module."""
    B, C, H, W = output_nchw.shape
    feat = jnp.transpose(output_nchw, (0, 2, 3, 1)).reshape(B, H * W, C)
    pred = jax.vmap(lambda f, i: f[i])(feat, ind).reshape(-1, 8)
    tb = rotbin.reshape(-1, 2)
    tr = rotres.reshape(-1, 2)
    m = mask.reshape(-1, 1).astype(jnp.float32)

    def ce(logits, tgt):
        logits = logits * m
        lse = jax.scipy.special.logsumexp(logits, axis=1)
        sel = jnp.where(tgt != 0, logits[:, 1], logits[:, 0])
        return jnp.mean(lse - sel)

    loss_bin1 = ce(pred[:, 0:2], tb[:, 0])
    loss_bin2 = ce(pred[:, 4:6], tb[:, 1])

    def sl1(x, y):
        d = jnp.abs(x - y)
        return jnp.where(d < 1.0, 0.5 * d * d, d - 0.5)

    v1 = tb[:, 0] != 0
    n1 = jnp.sum(v1)
    s1 = jnp.sum(jnp.where(v1, sl1(pred[:, 2], jnp.sin(tr[:, 0])), 0.0))
    c1 = jnp.sum(jnp.where(v1, sl1(pred[:, 3], jnp.cos(tr[:, 0])), 0.0))
    res1 = jnp.where(n1 > 0, (s1 + c1) / jnp.maximum(n1, 1), 0.0)

    v2 = tb[:, 1] != 0
    n2 = jnp.sum(v2)
    s2 = jnp.sum(jnp.where(v2, sl1(pred[:, 6], jnp.sin(tr[:, 1])), 0.0))
    c2 = jnp.sum(jnp.where(v2, sl1(pred[:, 7], jnp.cos(tr[:, 1])), 0.0))
    res2 = jnp.where(n2 > 0, (s2 + c2) / jnp.maximum(n2, 1), 0.0)

    return loss_bin1 + loss_bin2 + res1 + res2


if __name__ == "__main__":
    B, K, H, W = 2, 8, 16, 16      # batch, max objects, spatial
    C = 8                          # fixed by the rotation head

    key = jax.random.PRNGKey(0)
    k1, k2, k3, k4, k5 = jax.random.split(key, 5)
    output = jax.random.normal(k1, (B, C, H, W), dtype=jnp.float32)
    ind = jax.random.randint(k2, (B, K), 0, H * W, dtype=jnp.int32)
    mask = jax.random.bernoulli(k3, 0.7, (B, K)).astype(jnp.float32)
    rotbin = jax.random.bernoulli(k4, 0.5, (B, K, 2)).astype(jnp.int32)
    rotres = jax.random.uniform(k5, (B, K, 2), minval=-3.14159, maxval=3.14159,
                                dtype=jnp.float32)

    loss = jax.block_until_ready(bin_rot_loss(output, mask, ind, rotbin, rotres))
    loss_ref = jax.block_until_ready(bin_rot_loss_ref(output, mask, ind, rotbin, rotres))

    assert jnp.allclose(loss, loss_ref, rtol=1e-4, atol=1e-4), (loss, loss_ref)
    print("KERNEL_OK")
</pallas_src>

<mosaic_0001>
module attributes {stable_mosaic.version = 11 : i64} {
  func.func @binrot_kernel(%arg0: i32, %arg1: i32, %arg2: memref<2x8x256xf32, #tpu.memory_space<vmem>>, %arg3: memref<2x1x8xi32, #tpu.memory_space<vmem>>, %arg4: memref<2x8x8xf32, #tpu.memory_space<vmem>>, %arg5: memref<2x6x1xf32, #tpu.memory_space<vmem>>, %arg6: memref<2x8x8xf32, #tpu.memory_space<vmem>>) attributes {dimension_semantics = [#tpu.dimension_semantics<parallel>, #tpu.dimension_semantics<arbitrary>], iteration_bounds = array<i64: 1, 1>, scalar_prefetch = 0 : i64, scratch_operands = 1 : i64, tpu.core_type = #tpu.core_type<tc>, window_params = [{transform_indices = @transform_0, window_bounds = array<i64: 2, 8, 256>}, {transform_indices = @transform_1, window_bounds = array<i64: 2, 1, 8>}, {transform_indices = @transform_2, window_bounds = array<i64: 2, 8, 8>}, {transform_indices = @transform_3, window_bounds = array<i64: 2, 6, 1>}]} {
    %c0_i32 = arith.constant 0 : i32
    %0 = arith.cmpi eq, %arg1, %c0_i32 : i32
    %1 = arith.extui %0 : i1 to i32
    %c0_i32_0 = arith.constant 0 : i32
    %2 = arith.cmpi ne, %1, %c0_i32_0 : i32
    scf.if %2 {
      %cst_14 = arith.constant 0.000000e+00 : f32
      %22 = vector.broadcast %cst_14 : f32 to vector<2x8x8xf32>
      %c0_15 = arith.constant 0 : index
      %c0_16 = arith.constant 0 : index
      %c0_17 = arith.constant 0 : index
      %23 = vector.load %arg6[%c0_15, %c0_16, %c0_17] : memref<2x8x8xf32, #tpu.memory_space<vmem>>, vector<2x8x8xf32>
      tpu.vector_store %arg6[%c0_15, %c0_16, %c0_17], %22 {strides = array<i32>} : memref<2x8x8xf32, #tpu.memory_space<vmem>>, vector<2x8x8xf32>,
    } else {
    }
    %c0 = arith.constant 0 : index
    %c0_1 = arith.constant 0 : index
    %c0_2 = arith.constant 0 : index
    %3 = vector.load %arg2[%c0, %c0_1, %c0_2] : memref<2x8x256xf32, #tpu.memory_space<vmem>>, vector<2x8x256xf32>
    %c0_3 = arith.constant 0 : index
    %c0_4 = arith.constant 0 : index
    %c0_5 = arith.constant 0 : index
    %4 = vector.load %arg3[%c0_3, %c0_4, %c0_5] : memref<2x1x8xi32, #tpu.memory_space<vmem>>, vector<2x1x8xi32>
    %5 = tpu.iota {dimensions = array<i32: 0>} : vector<256x1xi32>
    %c256_i32 = arith.constant 256 : i32
    %6 = arith.muli %arg1, %c256_i32 : i32
    %7 = vector.broadcast %6 : i32 to vector<256x1xi32>
    %8 = arith.addi %5, %7 : vector<256x1xi32>
    %9 = vector.shape_cast %8 : vector<256x1xi32> to vector<1x256x1xi32>
    %10 = vector.broadcast %9 : vector<1x256x1xi32> to vector<2x256x8xi32>
    %11 = vector.broadcast %4 : vector<2x1x8xi32> to vector<2x256x8xi32>
    %12 = arith.cmpi eq, %10, %11 : vector<2x256x8xi32>
    %13 = arith.extui %12 : vector<2x256x8xi1> to vector<2x256x8xi32>
    %14 = arith.sitofp %13 : vector<2x256x8xi32> to vector<2x256x8xf32>
    %c0_6 = arith.constant 0 : index
    %c0_7 = arith.constant 0 : index
    %c0_8 = arith.constant 0 : index
    %15 = vector.load %arg6[%c0_6, %c0_7, %c0_8] : memref<2x8x8xf32, #tpu.memory_space<vmem>>, vector<2x8x8xf32>
    "tpu.trace_start"() <{level = 10 : i32, message = "bct,btk->bck"}> : () -> ()
    %cst = arith.constant dense<0.000000e+00> : vector<2x8x8xf32>
    %16 = tpu.matmul %3, %14, %cst {dimension_numbers = #tpu.dot_dimension_numbers<[2], [1], [1], [2], [0, 0, 0, 1, 1, 2], [0], [0]>} : vector<2x8x256xf32>, vector<2x256x8xf32>, vector<2x8x8xf32> -> vector<2x8x8xf32>
    "tpu.trace_stop"() : () -> ()
    %17 = arith.addf %15, %16 : vector<2x8x8xf32>
    %c0_9 = arith.constant 0 : index
    %c0_10 = arith.constant 0 : index
    %c0_11 = arith.constant 0 : index
    %18 = vector.load %arg6[%c0_9, %c0_10, %c0_11] : memref<2x8x8xf32, #tpu.memory_space<vmem>>, vector<2x8x8xf32>
    tpu.vector_store %arg6[%c0_9, %c0_10, %c0_11], %17 {strides = array<i32>} : memref<2x8x8xf32, #tpu.memory_space<vmem>>, vector<2x8x8xf32>,
    %c0_i32_12 = arith.constant 0 : i32
    %19 = arith.cmpi eq, %arg1, %c0_i32_12 : i32
    %20 = arith.extui %19 : i1 to i32
    %c0_i32_13 = arith.constant 0 : i32
    %21 = arith.cmpi ne, %20, %c0_i32_13 : i32
    scf.if %21 {
      %c0_14 = arith.constant 0 : index
      %c0_15 = arith.constant 0 : index
      %c0_16 = arith.constant 0 : index
      %22 = vector.load %arg6[%c0_14, %c0_15, %c0_16] : memref<2x8x8xf32, #tpu.memory_space<vmem>>, vector<2x8x8xf32>
      %c0_17 = arith.constant 0 : index
      %c0_18 = arith.constant 0 : index
      %c0_19 = arith.constant 0 : index
      %23 = vector.load %arg4[%c0_17, %c0_18, %c0_19] : memref<2x8x8xf32, #tpu.memory_space<vmem>>, vector<2x8x8xf32>
      %24 = vector.extract_strided_slice %23 {offsets = [0, 0, 0], sizes = [2, 1, 8], strides = [1, 1, 1]} : vector<2x8x8xf32> to vector<2x1x8xf32>
      %25 = vector.extract_strided_slice %23 {offsets = [0, 1, 0], sizes = [2, 1, 8], strides = [1, 1, 1]} : vector<2x8x8xf32> to vector<2x1x8xf32>
      %26 = vector.extract_strided_slice %23 {offsets = [0, 2, 0], sizes = [2, 1, 8], strides = [1, 1, 1]} : vector<2x8x8xf32> to vector<2x1x8xf32>
      %27 = vector.extract_strided_slice %22 {offsets = [0, 0, 0], sizes = [2, 1, 8], strides = [1, 1, 1]} : vector<2x8x8xf32> to vector<2x1x8xf32>
      %28 = vector.extract_strided_slice %22 {offsets = [0, 1, 0], sizes = [2, 1, 8], strides = [1, 1, 1]} : vector<2x8x8xf32> to vector<2x1x8xf32>
      %29 = arith.mulf %27, %24 : vector<2x1x8xf32>
      %30 = arith.mulf %28, %24 : vector<2x1x8xf32>
      %31 = arith.maximumf %29, %30 : vector<2x1x8xf32>
      %32 = arith.subf %29, %31 : vector<2x1x8xf32>
      %33 = math.exp %32 : vector<2x1x8xf32>
      %34 = arith.subf %30, %31 : vector<2x1x8xf32>
      %35 = math.exp %34 : vector<2x1x8xf32>
      %36 = arith.addf %33, %35 : vector<2x1x8xf32>
      %37 = math.log %36 : vector<2x1x8xf32>
      %38 = arith.addf %31, %37 : vector<2x1x8xf32>
      %cst_20 = arith.constant 0.000000e+00 : f32
      %39 = vector.broadcast %cst_20 : f32 to vector<2x1x8xf32>
      %40 = arith.cmpf one, %25, %39 : vector<2x1x8xf32>
      %41 = arith.select %40, %30, %29 : vector<2x1x8xi1>, vector<2x1x8xf32>
      %42 = arith.subf %38, %41 : vector<2x1x8xf32>
      %43 = vector.extract_strided_slice %22 {offsets = [0, 4, 0], sizes = [2, 1, 8], strides = [1, 1, 1]} : vector<2x8x8xf32> to vector<2x1x8xf32>
      %44 = vector.extract_strided_slice %22 {offsets = [0, 5, 0], sizes = [2, 1, 8], strides = [1, 1, 1]} : vector<2x8x8xf32> to vector<2x1x8xf32>
      %45 = arith.mulf %43, %24 : vector<2x1x8xf32>
      %46 = arith.mulf %44, %24 : vector<2x1x8xf32>
      %47 = arith.maximumf %45, %46 : vector<2x1x8xf32>
      %48 = arith.subf %45, %47 : vector<2x1x8xf32>
      %49 = math.exp %48 : vector<2x1x8xf32>
      %50 = arith.subf %46, %47 : vector<2x1x8xf32>
      %51 = math.exp %50 : vector<2x1x8xf32>
      %52 = arith.addf %49, %51 : vector<2x1x8xf32>
      %53 = math.log %52 : vector<2x1x8xf32>
      %54 = arith.addf %47, %53 : vector<2x1x8xf32>
      %cst_21 = arith.constant 0.000000e+00 : f32
      %55 = vector.broadcast %cst_21 : f32 to vector<2x1x8xf32>
      %56 = arith.cmpf one, %26, %55 : vector<2x1x8xf32>
      %57 = arith.select %56, %46, %45 : vector<2x1x8xi1>, vector<2x1x8xf32>
      %58 = arith.subf %54, %57 : vector<2x1x8xf32>
      %59 = vector.extract_strided_slice %22 {offsets = [0, 2, 0], sizes = [2, 1, 8], strides = [1, 1, 1]} : vector<2x8x8xf32> to vector<2x1x8xf32>
      %60 = vector.extract_strided_slice %23 {offsets = [0, 3, 0], sizes = [2, 1, 8], strides = [1, 1, 1]} : vector<2x8x8xf32> to vector<2x1x8xf32>
      %61 = arith.subf %59, %60 : vector<2x1x8xf32>
      %62 = math.absf %61 : vector<2x1x8xf32>
      %cst_22 = arith.constant 1.000000e+00 : f32
      %63 = vector.broadcast %cst_22 : f32 to vector<2x1x8xf32>
      %64 = arith.cmpf olt, %62, %63 : vector<2x1x8xf32>
      %cst_23 = arith.constant 5.000000e-01 : f32
      %65 = vector.broadcast %cst_23 : f32 to vector<2x1x8xf32>
      %66 = arith.mulf %65, %62 : vector<2x1x8xf32>
      %67 = arith.mulf %66, %62 : vector<2x1x8xf32>
      %cst_24 = arith.constant 5.000000e-01 : f32
      %68 = vector.broadcast %cst_24 : f32 to vector<2x1x8xf32>
      %69 = arith.subf %62, %68 : vector<2x1x8xf32>
      %70 = arith.select %64, %67, %69 : vector<2x1x8xi1>, vector<2x1x8xf32>
      %cst_25 = arith.constant 0.000000e+00 : f32
      %71 = vector.broadcast %cst_25 : f32 to vector<2x1x8xf32>
      %72 = arith.cmpf one, %25, %71 : vector<2x1x8xf32>
      %cst_26 = arith.constant 0.000000e+00 : f32
      %73 = vector.broadcast %cst_26 : f32 to vector<2x1x8xf32>
      %74 = arith.select %72, %70, %73 : vector<2x1x8xi1>, vector<2x1x8xf32>
      %75 = vector.extract_strided_slice %22 {offsets = [0, 3, 0], sizes = [2, 1, 8], strides = [1, 1, 1]} : vector<2x8x8xf32> to vector<2x1x8xf32>
      %76 = vector.extract_strided_slice %23 {offsets = [0, 4, 0], sizes = [2, 1, 8], strides = [1, 1, 1]} : vector<2x8x8xf32> to vector<2x1x8xf32>
      %77 = arith.subf %75, %76 : vector<2x1x8xf32>
      %78 = math.absf %77 : vector<2x1x8xf32>
      %cst_27 = arith.constant 1.000000e+00 : f32
      %79 = vector.broadcast %cst_27 : f32 to vector<2x1x8xf32>
      %80 = arith.cmpf olt, %78, %79 : vector<2x1x8xf32>
      %cst_28 = arith.constant 5.000000e-01 : f32
      %81 = vector.broadcast %cst_28 : f32 to vector<2x1x8xf32>
      %82 = arith.mulf %81, %78 : vector<2x1x8xf32>
      %83 = arith.mulf %82, %78 : vector<2x1x8xf32>
      %cst_29 = arith.constant 5.000000e-01 : f32
      %84 = vector.broadcast %cst_29 : f32 to vector<2x1x8xf32>
      %85 = arith.subf %78, %84 : vector<2x1x8xf32>
      %86 = arith.select %80, %83, %85 : vector<2x1x8xi1>, vector<2x1x8xf32>
      %cst_30 = arith.constant 0.000000e+00 : f32
      %87 = vector.broadcast %cst_30 : f32 to vector<2x1x8xf32>
      %88 = arith.cmpf one, %25, %87 : vector<2x1x8xf32>
      %cst_31 = arith.constant 0.000000e+00 : f32
      %89 = vector.broadcast %cst_31 : f32 to vector<2x1x8xf32>
      %90 = arith.select %88, %86, %89 : vector<2x1x8xi1>, vector<2x1x8xf32>
      %91 = vector.extract_strided_slice %22 {offsets = [0, 6, 0], sizes = [2, 1, 8], strides = [1, 1, 1]} : vector<2x8x8xf32> to vector<2x1x8xf32>
      %92 = vector.extract_strided_slice %23 {offsets = [0, 5, 0], sizes = [2, 1, 8], strides = [1, 1, 1]} : vector<2x8x8xf32> to vector<2x1x8xf32>
      %93 = arith.subf %91, %92 : vector<2x1x8xf32>
      %94 = math.absf %93 : vector<2x1x8xf32>
      %cst_32 = arith.constant 1.000000e+00 : f32
      %95 = vector.broadcast %cst_32 : f32 to vector<2x1x8xf32>
      %96 = arith.cmpf olt, %94, %95 : vector<2x1x8xf32>
      %cst_33 = arith.constant 5.000000e-01 : f32
      %97 = vector.broadcast %cst_33 : f32 to vector<2x1x8xf32>
      %98 = arith.mulf %97, %94 : vector<2x1x8xf32>
      %99 = arith.mulf %98, %94 : vector<2x1x8xf32>
      %cst_34 = arith.constant 5.000000e-01 : f32
      %100 = vector.broadcast %cst_34 : f32 to vector<2x1x8xf32>
      %101 = arith.subf %94, %100 : vector<2x1x8xf32>
      %102 = arith.select %96, %99, %101 : vector<2x1x8xi1>, vector<2x1x8xf32>
      %cst_35 = arith.constant 0.000000e+00 : f32
      %103 = vector.broadcast %cst_35 : f32 to vector<2x1x8xf32>
      %104 = arith.cmpf one, %26, %103 : vector<2x1x8xf32>
      %cst_36 = arith.constant 0.000000e+00 : f32
      %105 = vector.broadcast %cst_36 : f32 to vector<2x1x8xf32>
      %106 = arith.select %104, %102, %105 : vector<2x1x8xi1>, vector<2x1x8xf32>
      %107 = vector.extract_strided_slice %22 {offsets = [0, 7, 0], sizes = [2, 1, 8], strides = [1, 1, 1]} : vector<2x8x8xf32> to vector<2x1x8xf32>
      %108 = vector.extract_strided_slice %23 {offsets = [0, 6, 0], sizes = [2, 1, 8], strides = [1, 1, 1]} : vector<2x8x8xf32> to vector<2x1x8xf32>
      %109 = arith.subf %107, %108 : vector<2x1x8xf32>
      %110 = math.absf %109 : vector<2x1x8xf32>
      %cst_37 = arith.constant 1.000000e+00 : f32
      %111 = vector.broadcast %cst_37 : f32 to vector<2x1x8xf32>
      %112 = arith.cmpf olt, %110, %111 : vector<2x1x8xf32>
      %cst_38 = arith.constant 5.000000e-01 : f32
      %113 = vector.broadcast %cst_38 : f32 to vector<2x1x8xf32>
      %114 = arith.mulf %113, %110 : vector<2x1x8xf32>
      %115 = arith.mulf %114, %110 : vector<2x1x8xf32>
      %cst_39 = arith.constant 5.000000e-01 : f32
      %116 = vector.broadcast %cst_39 : f32 to vector<2x1x8xf32>
      %117 = arith.subf %110, %116 : vector<2x1x8xf32>
      %118 = arith.select %112, %115, %117 : vector<2x1x8xi1>, vector<2x1x8xf32>
      %cst_40 = arith.constant 0.000000e+00 : f32
      %119 = vector.broadcast %cst_40 : f32 to vector<2x1x8xf32>
      %120 = arith.cmpf one, %26, %119 : vector<2x1x8xf32>
      %cst_41 = arith.constant 0.000000e+00 : f32
      %121 = vector.broadcast %cst_41 : f32 to vector<2x1x8xf32>
      %122 = arith.select %120, %118, %121 : vector<2x1x8xi1>, vector<2x1x8xf32>
      %cst_42 = arith.constant dense<0.000000e+00> : vector<2x1xf32>
      %123 = vector.multi_reduction <add>, %42, %cst_42 [2] : vector<2x1x8xf32> to vector<2x1xf32>
      %124 = vector.shape_cast %123 : vector<2x1xf32> to vector<2x1x1xf32>
      %c0_43 = arith.constant 0 : index
      %c0_44 = arith.constant 0 : index
      %c0_45 = arith.constant 0 : index
      %125 = vector.load %arg5[%c0_43, %c0_44, %c0_45] : memref<2x6x1xf32, #tpu.memory_space<vmem>>, vector<2x1x1xf32>
      tpu.vector_store %arg5[%c0_43, %c0_44, %c0_45], %124 {strides = array<i32>} : memref<2x6x1xf32, #tpu.memory_space<vmem>>, vector<2x1x1xf32>,
      %cst_46 = arith.constant dense<0.000000e+00> : vector<2x1xf32>
      %126 = vector.multi_reduction <add>, %58, %cst_46 [2] : vector<2x1x8xf32> to vector<2x1xf32>
      %127 = vector.shape_cast %126 : vector<2x1xf32> to vector<2x1x1xf32>
      %c0_47 = arith.constant 0 : index
      %c1 = arith.constant 1 : index
      %c0_48 = arith.constant 0 : index
      %128 = vector.load %arg5[%c0_47, %c1, %c0_48] : memref<2x6x1xf32, #tpu.memory_space<vmem>>, vector<2x1x1xf32>
      tpu.vector_store %arg5[%c0_47, %c1, %c0_48], %127 {strides = array<i32>} : memref<2x6x1xf32, #tpu.memory_space<vmem>>, vector<2x1x1xf32>,
      %cst_49 = arith.constant dense<0.000000e+00> : vector<2x1xf32>
      %129 = vector.multi_reduction <add>, %74, %cst_49 [2] : vector<2x1x8xf32> to vector<2x1xf32>
      %130 = vector.shape_cast %129 : vector<2x1xf32> to vector<2x1x1xf32>
      %c0_50 = arith.constant 0 : index
      %c2 = arith.constant 2 : index
      %c0_51 = arith.constant 0 : index
      %131 = vector.load %arg5[%c0_50, %c2, %c0_51] : memref<2x6x1xf32, #tpu.memory_space<vmem>>, vector<2x1x1xf32>
      tpu.vector_store %arg5[%c0_50, %c2, %c0_51], %130 {strides = array<i32>} : memref<2x6x1xf32, #tpu.memory_space<vmem>>, vector<2x1x1xf32>,
      %cst_52 = arith.constant dense<0.000000e+00> : vector<2x1xf32>
      %132 = vector.multi_reduction <add>, %90, %cst_52 [2] : vector<2x1x8xf32> to vector<2x1xf32>
      %133 = vector.shape_cast %132 : vector<2x1xf32> to vector<2x1x1xf32>
      %c0_53 = arith.constant 0 : index
      %c3 = arith.constant 3 : index
      %c0_54 = arith.constant 0 : index
      %134 = vector.load %arg5[%c0_53, %c3, %c0_54] : memref<2x6x1xf32, #tpu.memory_space<vmem>>, vector<2x1x1xf32>
      tpu.vector_store %arg5[%c0_53, %c3, %c0_54], %133 {strides = array<i32>} : memref<2x6x1xf32, #tpu.memory_space<vmem>>, vector<2x1x1xf32>,
      %cst_55 = arith.constant dense<0.000000e+00> : vector<2x1xf32>
      %135 = vector.multi_reduction <add>, %106, %cst_55 [2] : vector<2x1x8xf32> to vector<2x1xf32>
      %136 = vector.shape_cast %135 : vector<2x1xf32> to vector<2x1x1xf32>
      %c0_56 = arith.constant 0 : index
      %c4 = arith.constant 4 : index
      %c0_57 = arith.constant 0 : index
      %137 = vector.load %arg5[%c0_56, %c4, %c0_57] : memref<2x6x1xf32, #tpu.memory_space<vmem>>, vector<2x1x1xf32>
      tpu.vector_store %arg5[%c0_56, %c4, %c0_57], %136 {strides = array<i32>} : memref<2x6x1xf32, #tpu.memory_space<vmem>>, vector<2x1x1xf32>,
      %cst_58 = arith.constant dense<0.000000e+00> : vector<2x1xf32>
      %138 = vector.multi_reduction <add>, %122, %cst_58 [2] : vector<2x1x8xf32> to vector<2x1xf32>
      %139 = vector.shape_cast %138 : vector<2x1xf32> to vector<2x1x1xf32>
      %c0_59 = arith.constant 0 : index
      %c5 = arith.constant 5 : index
      %c0_60 = arith.constant 0 : index
      %140 = vector.load %arg5[%c0_59, %c5, %c0_60] : memref<2x6x1xf32, #tpu.memory_space<vmem>>, vector<2x1x1xf32>
      tpu.vector_store %arg5[%c0_59, %c5, %c0_60], %139 {strides = array<i32>} : memref<2x6x1xf32, #tpu.memory_space<vmem>>, vector<2x1x1xf32>,
    } else {
    }
    return
  }
  func.func @transform_0(%arg0: i32, %arg1: i32) -> (i32, i32, i32) {
    %c0_i32 = arith.constant 0 : i32
    %c0_i32_0 = arith.constant 0 : i32
    return %arg0, %c0_i32, %arg1 : i32, i32, i32
  }
  func.func @transform_1(%arg0: i32, %arg1: i32) -> (i32, i32, i32) {
    %c0_i32 = arith.constant 0 : i32
    %c0_i32_0 = arith.constant 0 : i32
    %c0_i32_1 = arith.constant 0 : i32
    return %arg0, %c0_i32, %c0_i32_0 : i32, i32, i32
  }
  func.func @transform_2(%arg0: i32, %arg1: i32) -> (i32, i32, i32) {
    %c0_i32 = arith.constant 0 : i32
    %c0_i32_0 = arith.constant 0 : i32
    %c0_i32_1 = arith.constant 0 : i32
    return %arg0, %c0_i32, %c0_i32_0 : i32, i32, i32
  }
  func.func @transform_3(%arg0: i32, %arg1: i32) -> (i32, i32, i32) {
    %c0_i32 = arith.constant 0 : i32
    %c0_i32_0 = arith.constant 0 : i32
    %c0_i32_1 = arith.constant 0 : i32
    return %arg0, %c0_i32, %c0_i32_0 : i32, i32, i32
  }
}

</mosaic_0001>

<bundles_post_ra>
// kernel: tpu_custom_call.1
= control target key start
LH: loop header
LB: loop body
LE: loop exit
PB: predicated region body
PF: predicated region fallthrough
CT: control target
= control target key end

     0   :  { %8 = vsyncpa [#allocation4], 0  ;;  %s1431_s0 = inlined_call_operand.hbm [shape: f32[2,8,256], index: 0, kind: input, shape index: {}]   ;;  %s1432_s1 = inlined_call_operand.hbm [shape: s32[2,1,8], index: 1, kind: input, shape index: {}]   ;;  %s1433_s2 = inlined_call_operand.hbm [shape: f32[2,8,8], index: 2, kind: input, shape index: {}]   ;;  %s1434_s3 = inlined_call_operand.vmem [shape: f32[2,6,1], index: 3, kind: output, shape index: {}]  }
   0x1   :  { %9 = vsyncpa [#allocation6], 0  ;;  %s1053_s12 = smov [#allocation5]  }
   0x2   :  { %s27_s13 = sshll.u32 %s1053_s12, 4  ;;  %s28_s13 = int_to_ptr.vmem [resolvable:$true] %s27_s13 }
   0x3   :  { %s997_s14 = scalar_lea.vmem %s28_s13, 32  ;;  %p1002_p1 = scmp.lt.s32.totalorder %s28_s13, %s28_s13 }
   0x4   :  { %p998_p0 = scmp.ne.s32.totalorder %s28_s13, %s997_s14  ;;  %p1003_p2 = scmp.lt.s32.totalorder %s997_s14, %s997_s14 }
   0x6   :  { %p1004_p3 = por %p1003_p2, %p1002_p1 }
   0x8   :  { %p1005_p4 = pnand %p1004_p3, %p998_p0 }
   0xa   :  { %1008 = shalt.err (!%p1005_p4)
}
   0xb   :  { %s1054_s15 = smov 16   ;;  %s1055_s16 = smov 1  }
   0xc   :  { %33 = dma.hbm_to_vmem [thread:$0]  %s1432_s1, 32, %s28_s13, [#allocation6], %s1054_s15, %s1054_s15, %s1055_s16  }
   0xd   :  { %s1056_s19 = smov [#allocation3]  }
   0xe   :  { %s15_s20 = sshll.u32 %s1056_s19, 4  ;;  %s16_s20 = int_to_ptr.vmem [resolvable:$true] %s15_s20 }
   0xf   :  { %s1017_s21 = scalar_lea.vmem %s16_s20, 512  ;;  %p1022_p6 = scmp.lt.s32.totalorder %s16_s20, %s16_s20 }
  0x10   :  { %p1018_p5 = scmp.ne.s32.totalorder %s16_s20, %s1017_s21  ;;  %p1023_p7 = scmp.lt.s32.totalorder %s1017_s21, %s1017_s21 }
  0x12   :  { %p1024_p8 = por %p1023_p7, %p1022_p6 }
  0x14   :  { %p1025_p9 = pnand %p1024_p8, %p1018_p5 }
  0x16   :  { %1028 = shalt.err (!%p1025_p9)
}
  0x17   :  { %s1057_s22 = smov 256   ;;  %s1058_s25 = smov [#allocation7]  }
  0x18   :  { %21 = dma.hbm_to_vmem [thread:$0]  %s1431_s0, 512, %s16_s20, [#allocation4], %s1057_s22, %s1057_s22, %s1054_s15  }
  0x19   :  { %s39_s26 = sshll.u32 %s1058_s25, 4  ;;  %s40_s26 = int_to_ptr.vmem [resolvable:$true] %s39_s26 }
  0x1a   :  { %s1037_s27 = scalar_lea.vmem %s40_s26, 256  ;;  %p1042_p11 = scmp.lt.s32.totalorder %s40_s26, %s40_s26 }
  0x1b   :  { %p1038_p10 = scmp.ne.s32.totalorder %s40_s26, %s1037_s27  ;;  %p1043_p12 = scmp.lt.s32.totalorder %s1037_s27, %s1037_s27 }
  0x1d   :  { %p1044_p13 = por %p1043_p12, %p1042_p11 }
  0x1f   :  { %p1045_p0 = pnand %p1044_p13, %p1038_p10 }
  0x21   :  { %1048 = shalt.err (!%p1045_p0)
}
  0x22   :  { %s1059_s1 = smov 128   ;;  %s1060_s28 = smov 8  }
  0x23   :  { %45 = dma.hbm_to_vmem [thread:$0]  %s1433_s2, 256, %s40_s26, [#allocation6], %s1059_s1, %s1059_s1, %s1060_s28  }
  0x24   :  { %1049 = dma.done.wait [#allocation4], 512  }
  0x25   :  { %1050 = vsyncadd [#allocation4], 4294966784 }
  0x26   :  { %1051 = dma.done.wait [#allocation6], 288  }
  0x27   :  { %1052 = vsyncadd [#allocation6], 4294967008  ;;  %v68_v0 = vlaneseq  ;;  %v1099_v7 = vld [vmem:[#allocation5] ss:$0 sm:$0xff]  ;;  %v1101_v8 = vld [vmem:[#allocation5 + $0x1] ss:$0 sm:$0xff] }
  0x28   :  { %v1061_v11 = vmov 1.0   ;;  %v63_v36 = vld [vmem:[#allocation3 + $0x8] sm:$0xff]  ;;  %v65_v37 = vld [vmem:[#allocation3 + $0x18] sm:$0xff]  ;;  %v62_v38 = vld [vmem:[#allocation3] sm:$0xff]  ;;  %v1062_v40 = vmov 0.0  }
  0x29   :  { %v1092_v1 = vshrl.u32 %v68_v0, 7  ;;  %v64_v39 = vld [vmem:[#allocation3 + $0x10] sm:$0xff]  ;;  %401 = vmatprep.mubr.f32.mxu0 %v63_v36  ;;  %471 = vmatprep.mubr.f32.mxu1 %v65_v37  ;;  %v1261_v52 = vld [vmem:[#allocation7] sm:$0xff] }
  0x2a   :  { %v1259_v51 = vld [vmem:[#allocation7 + $0x8] sm:$0xff]  ;;  %v629_v54 = vrot.slane %v1261_v52, 1  ;;  %v493_v56 = vrot.slane %v1261_v52, 7  ;;  %v563_v57 = vrot.slane %v1261_v52, 3  ;;  %v557_v60 = vrot.slane %v1261_v52, 4 }
  0x2b   :  { %v100_v2 = vadd.s32 248, %v1092_v1  ;;  %v84_v3 = vadd.s32 120, %v1092_v1  ;;  %v99_v4 = vadd.s32 240, %v1092_v1  ;;  %v83_v5 = vadd.s32 112, %v1092_v1 }
  0x2c   :  { %v98_v6 = vadd.s32 232, %v1092_v1  ;;  %v82_v9 = vadd.s32 104, %v1092_v1  ;;  %v97_v10 = vadd.s32 224, %v1092_v1  ;;  %v81_v12 = vadd.s32 96, %v1092_v1 }
  0x2d   :  { %vm174_vm0 = vcmp.eq.s32.totalorder %v100_v2, %v1099_v7  ;;  %vm206_vm1 = vcmp.eq.s32.totalorder %v100_v2, %v1101_v8  ;;  %vm158_vm2 = vcmp.eq.s32.totalorder %v84_v3, %v1099_v7  ;;  %vm190_vm3 = vcmp.eq.s32.totalorder %v84_v3, %v1101_v8 }
  0x2e   :  { %885 = vmatprep.subr.msk.mxu0 %vm174_vm0, %v1061_v11  ;;  %920 = vmatprep.subr.msk.mxu1 %vm206_vm1, %v1061_v11  ;;  %vm173_vm4 = vcmp.eq.s32.totalorder %v99_v4, %v1099_v7  ;;  %vm205_vm5 = vcmp.eq.s32.totalorder %v99_v4, %v1101_v8  ;;  %vm157_vm6 = vcmp.eq.s32.totalorder %v83_v5, %v1099_v7  ;;  %v96_v13 = vadd.s32 216, %v1092_v1 }
  0x2f   :  { %886 = vmatpush3.msk.msra.mxu0 %vm158_vm2, %v1061_v11  ;;  %921 = vmatpush3.msk.msra.mxu1 %vm190_vm3, %v1061_v11  ;;  %vm189_vm7 = vcmp.eq.s32.totalorder %v83_v5, %v1101_v8  ;;  %vm172_vm8 = vcmp.eq.s32.totalorder %v98_v6, %v1099_v7  ;;  %vm204_vm9 = vcmp.eq.s32.totalorder %v98_v6, %v1101_v8  ;;  %v80_v14 = vadd.s32 88, %v1092_v1 }
  0x30   :  { %887 = vmatprep.subr.msk.mxu0 %vm173_vm4, %v1061_v11  ;;  %922 = vmatprep.subr.msk.mxu1 %vm205_vm5, %v1061_v11  ;;  %vm156_vm10 = vcmp.eq.s32.totalorder %v82_v9, %v1099_v7  ;;  %vm188_vm11 = vcmp.eq.s32.totalorder %v82_v9, %v1101_v8  ;;  %vm171_vm12 = vcmp.eq.s32.totalorder %v97_v10, %v1099_v7  ;;  %v95_v15 = vadd.s32 208, %v1092_v1 }
  0x31   :  { %888 = vmatpush3.msk.msra.mxu0 %vm157_vm6, %v1061_v11  ;;  %923 = vmatpush3.msk.msra.mxu1 %vm189_vm7, %v1061_v11  ;;  %vm203_vm13 = vcmp.eq.s32.totalorder %v97_v10, %v1101_v8  ;;  %vm155_vm14 = vcmp.eq.s32.totalorder %v81_v12, %v1099_v7  ;;  %vm187_vm15 = vcmp.eq.s32.totalorder %v81_v12, %v1101_v8  ;;  %v79_v16 = vadd.s32 80, %v1092_v1 }
  0x32   :  { %889 = vmatprep.subr.msk.mxu0 %vm172_vm8, %v1061_v11  ;;  %924 = vmatprep.subr.msk.mxu1 %vm204_vm9, %v1061_v11  ;;  %vm170_vm0 = vcmp.eq.s32.totalorder %v96_v13, %v1099_v7  ;;  %vm202_vm1 = vcmp.eq.s32.totalorder %v96_v13, %v1101_v8  ;;  %v94_v17 = vadd.s32 200, %v1092_v1  ;;  %vm154_vm2 = vcmp.eq.s32.totalorder %v80_v14, %v1099_v7 }
  0x33   :  { %890 = vmatpush3.msk.msra.mxu0 %vm156_vm10, %v1061_v11  ;;  %925 = vmatpush3.msk.msra.mxu1 %vm188_vm11, %v1061_v11  ;;  %vm186_vm3 = vcmp.eq.s32.totalorder %v80_v14, %v1101_v8  ;;  %v78_v18 = vadd.s32 72, %v1092_v1  ;;  %vm169_vm4 = vcmp.eq.s32.totalorder %v95_v15, %v1099_v7  ;;  %vm201_vm5 = vcmp.eq.s32.totalorder %v95_v15, %v1101_v8 }
  0x34   :  { %891 = vmatprep.subr.msk.mxu0 %vm171_vm12, %v1061_v11  ;;  %926 = vmatprep.subr.msk.mxu1 %vm203_vm13, %v1061_v11  ;;  %v93_v19 = vadd.s32 192, %v1092_v1  ;;  %vm153_vm6 = vcmp.eq.s32.totalorder %v79_v16, %v1099_v7  ;;  %vm185_vm7 = vcmp.eq.s32.totalorder %v79_v16, %v1101_v8  ;;  %v77_v20 = vadd.s32 64, %v1092_v1 }
  0x35   :  { %892 = vmatpush3.msk.msra.mxu0 %vm155_vm14, %v1061_v11  ;;  %927 = vmatpush3.msk.msra.mxu1 %vm187_vm15, %v1061_v11  ;;  %vm168_vm8 = vcmp.eq.s32.totalorder %v94_v17, %v1099_v7  ;;  %vm200_vm9 = vcmp.eq.s32.totalorder %v94_v17, %v1101_v8  ;;  %v92_v21 = vadd.s32 184, %v1092_v1  ;;  %vm152_vm10 = vcmp.eq.s32.totalorder %v78_v18, %v1099_v7 }
  0x36   :  { %893 = vmatprep.subr.msk.mxu0 %vm170_vm0, %v1061_v11  ;;  %928 = vmatprep.subr.msk.mxu1 %vm202_vm1, %v1061_v11  ;;  %vm184_vm11 = vcmp.eq.s32.totalorder %v78_v18, %v1101_v8  ;;  %v76_v22 = vadd.s32 56, %v1092_v1  ;;  %vm167_vm12 = vcmp.eq.s32.totalorder %v93_v19, %v1099_v7  ;;  %vm199_vm13 = vcmp.eq.s32.totalorder %v93_v19, %v1101_v8 }
  0x37   :  { %894 = vmatpush3.msk.msra.mxu0 %vm154_vm2, %v1061_v11  ;;  %929 = vmatpush3.msk.msra.mxu1 %vm186_vm3, %v1061_v11  ;;  %v91_v23 = vadd.s32 176, %v1092_v1  ;;  %vm151_vm14 = vcmp.eq.s32.totalorder %v77_v20, %v1099_v7  ;;  %vm183_vm15 = vcmp.eq.s32.totalorder %v77_v20, %v1101_v8  ;;  %v75_v24 = vadd.s32 48, %v1092_v1 }
  0x38   :  { %895 = vmatprep.subr.msk.mxu0 %vm169_vm4, %v1061_v11  ;;  %930 = vmatprep.subr.msk.mxu1 %vm201_vm5, %v1061_v11  ;;  %vm166_vm0 = vcmp.eq.s32.totalorder %v92_v21, %v1099_v7  ;;  %vm198_vm1 = vcmp.eq.s32.totalorder %v92_v21, %v1101_v8  ;;  %v90_v25 = vadd.s32 168, %v1092_v1  ;;  %vm150_vm2 = vcmp.eq.s32.totalorder %v76_v22, %v1099_v7 }
  0x39   :  { %896 = vmatpush3.msk.msra.mxu0 %vm153_vm6, %v1061_v11  ;;  %931 = vmatpush3.msk.msra.mxu1 %vm185_vm7, %v1061_v11  ;;  %vm182_vm3 = vcmp.eq.s32.totalorder %v76_v22, %v1101_v8  ;;  %v74_v26 = vadd.s32 40, %v1092_v1  ;;  %vm165_vm4 = vcmp.eq.s32.totalorder %v91_v23, %v1099_v7  ;;  %vm197_vm5 = vcmp.eq.s32.totalorder %v91_v23, %v1101_v8 }
  0x3a   :  { %897 = vmatprep.subr.msk.mxu0 %vm168_vm8, %v1061_v11  ;;  %932 = vmatprep.subr.msk.mxu1 %vm200_vm9, %v1061_v11  ;;  %v89_v27 = vadd.s32 160, %v1092_v1  ;;  %vm149_vm6 = vcmp.eq.s32.totalorder %v75_v24, %v1099_v7  ;;  %vm181_vm7 = vcmp.eq.s32.totalorder %v75_v24, %v1101_v8  ;;  %v73_v28 = vadd.s32 32, %v1092_v1 }
  0x3b   :  { %898 = vmatpush3.msk.msra.mxu0 %vm152_vm10, %v1061_v11  ;;  %933 = vmatpush3.msk.msra.mxu1 %vm184_vm11, %v1061_v11  ;;  %vm164_vm8 = vcmp.eq.s32.totalorder %v90_v25, %v1099_v7  ;;  %vm196_vm9 = vcmp.eq.s32.totalorder %v90_v25, %v1101_v8  ;;  %v88_v29 = vadd.s32 152, %v1092_v1  ;;  %vm148_vm10 = vcmp.eq.s32.totalorder %v74_v26, %v1099_v7 }
  0x3c   :  { %899 = vmatprep.subr.msk.mxu0 %vm167_vm12, %v1061_v11  ;;  %934 = vmatprep.subr.msk.mxu1 %vm199_vm13, %v1061_v11  ;;  %vm180_vm11 = vcmp.eq.s32.totalorder %v74_v26, %v1101_v8  ;;  %v72_v30 = vadd.s32 24, %v1092_v1  ;;  %vm163_vm12 = vcmp.eq.s32.totalorder %v89_v27, %v1099_v7  ;;  %vm195_vm13 = vcmp.eq.s32.totalorder %v89_v27, %v1101_v8 }
  0x3d   :  { %900 = vmatpush3.msk.msra.mxu0 %vm151_vm14, %v1061_v11  ;;  %935 = vmatpush3.msk.msra.mxu1 %vm183_vm15, %v1061_v11  ;;  %v87_v31 = vadd.s32 144, %v1092_v1  ;;  %vm147_vm14 = vcmp.eq.s32.totalorder %v73_v28, %v1099_v7  ;;  %vm179_vm15 = vcmp.eq.s32.totalorder %v73_v28, %v1101_v8  ;;  %v71_v32 = vadd.s32 16, %v1092_v1 }
  0x3e   :  { %901 = vmatprep.subr.msk.mxu0 %vm166_vm0, %v1061_v11  ;;  %936 = vmatprep.subr.msk.mxu1 %vm198_vm1, %v1061_v11  ;;  %vm162_vm0 = vcmp.eq.s32.totalorder %v88_v29, %v1099_v7  ;;  %vm194_vm1 = vcmp.eq.s32.totalorder %v88_v29, %v1101_v8  ;;  %v86_v33 = vadd.s32 136, %v1092_v1  ;;  %v70_v34 = vadd.s32 8, %v1092_v1 }
  0x3f   :  { %902 = vmatpush3.msk.msra.mxu0 %vm150_vm2, %v1061_v11  ;;  %937 = vmatpush3.msk.msra.mxu1 %vm182_vm3, %v1061_v11  ;;  %vm146_vm2 = vcmp.eq.s32.totalorder %v72_v30, %v1099_v7  ;;  %vm178_vm3 = vcmp.eq.s32.totalorder %v72_v30, %v1101_v8  ;;  %v85_v35 = vadd.s32 128, %v1092_v1  ;;  %v630_v53 = vrot.slane %v1259_v51, 1 }
  0x40   :  { %903 = vmatprep.subr.msk.mxu0 %vm165_vm4, %v1061_v11  ;;  %938 = vmatprep.subr.msk.mxu1 %vm197_vm5, %v1061_v11  ;;  %vm161_vm4 = vcmp.eq.s32.totalorder %v87_v31, %v1099_v7  ;;  %vm193_vm5 = vcmp.eq.s32.totalorder %v87_v31, %v1101_v8  ;;  %v494_v55 = vrot.slane %v1259_v51, 7 }
  0x41   :  { %904 = vmatpush3.msk.msra.mxu0 %vm149_vm6, %v1061_v11  ;;  %939 = vmatpush3.msk.msra.mxu1 %vm181_vm7, %v1061_v11  ;;  %vm145_vm6 = vcmp.eq.s32.totalorder %v71_v32, %v1099_v7  ;;  %vm177_vm7 = vcmp.eq.s32.totalorder %v71_v32, %v1101_v8  ;;  %v558_v32 = vrot.slane %v1259_v51, 4 }
  0x42   :  { %905 = vmatprep.subr.msk.mxu0 %vm164_vm8, %v1061_v11  ;;  %940 = vmatprep.subr.msk.mxu1 %vm196_vm9, %v1061_v11  ;;  %vm160_vm8 = vcmp.eq.s32.totalorder %v86_v33, %v1099_v7  ;;  %vm192_vm9 = vcmp.eq.s32.totalorder %v86_v33, %v1101_v8  ;;  %v564_v33 = vrot.slane %v1259_v51, 3 }
  0x43   :  { %906 = vmatpush3.msk.msra.mxu0 %vm148_vm10, %v1061_v11  ;;  %941 = vmatpush3.msk.msra.mxu1 %vm180_vm11, %v1061_v11  ;;  %vm144_vm10 = vcmp.eq.s32.totalorder %v70_v34, %v1099_v7  ;;  %vm176_vm11 = vcmp.eq.s32.totalorder %v70_v34, %v1101_v8 }
  0x44   :  { %907 = vmatprep.subr.msk.mxu0 %vm163_vm12, %v1061_v11  ;;  %942 = vmatprep.subr.msk.mxu1 %vm195_vm13, %v1061_v11  ;;  %vm159_vm12 = vcmp.eq.s32.totalorder %v85_v35, %v1099_v7  ;;  %vm191_vm13 = vcmp.eq.s32.totalorder %v85_v35, %v1101_v8 }
  0x45   :  { %908 = vmatpush3.msk.msra.mxu0 %vm147_vm14, %v1061_v11  ;;  %943 = vmatpush3.msk.msra.mxu1 %vm179_vm15, %v1061_v11  ;;  %vm143_vm14 = vcmp.eq.s32.totalorder %v1092_v1, %v1099_v7  ;;  %vm175_vm15 = vcmp.eq.s32.totalorder %v1092_v1, %v1101_v8 }
  0x46   :  { %909 = vmatprep.subr.msk.mxu0 %vm162_vm0, %v1061_v11  ;;  %944 = vmatprep.subr.msk.mxu1 %vm194_vm1, %v1061_v11  ;;  %vm59_vm0 = vcmask 64512   ;;  %vm540_vm1 = vcmp.ne.f32.partialorder %v1259_v51, 0.0 }
  0x47   :  { %910 = vmatpush3.msk.msra.mxu0 %vm146_vm2, %v1061_v11  ;;  %945 = vmatpush3.msk.msra.mxu1 %vm178_vm3, %v1061_v11  ;;  %60 = vst.msk [vmem:[#allocation2] sm:$0xff] %vm59_vm0, %v1062_v40  ;;  %61 = vst.msk [vmem:[#allocation2 + $0x8] sm:$0xff] %vm59_vm0, %v1062_v40  ;;  %vm709_vm2 = vcmask 58369   ;;  %vm539_vm3 = vcmp.ne.f32.partialorder %v1261_v52, 0.0 }
  0x48   :  { %911 = vmatprep.subr.msk.mxu0 %vm161_vm4, %v1061_v11  ;;  %946 = vmatprep.subr.msk.mxu1 %vm193_vm5, %v1061_v11 }
  0x49   :  { %912 = vmatpush3.msk.msra.mxu0 %vm145_vm6, %v1061_v11  ;;  %947 = vmatpush3.msk.msra.mxu1 %vm177_vm7, %v1061_v11 }
  0x4a   :  { %913 = vmatprep.subr.msk.mxu0 %vm160_vm8, %v1061_v11  ;;  %948 = vmatprep.subr.msk.mxu1 %vm192_vm9, %v1061_v11  ;;  %vm727_vm8 = vcmask 59394   ;;  %vm699_vm9 = vcmask 61444  }
  0x4b   :  { %914 = vmatpush3.msk.msra.mxu0 %vm144_vm10, %v1061_v11  ;;  %949 = vmatpush3.msk.msra.mxu1 %vm176_vm11, %v1061_v11  ;;  %vm689_vm10 = vcmask 57344   ;;  %vm716_vm11 = vcmask 1025  }
  0x4c   :  { %915 = vmatprep.subr.msk.mxu0 %vm159_vm12, %v1061_v11  ;;  %950 = vmatprep.subr.msk.mxu1 %vm191_vm13, %v1061_v11  ;;  %vm734_vm12 = vcmask 2050   ;;  %vm706_vm13 = vcmask 4100  }
  0x4d   :  { %916 = vmatpush3.msk.msra.mxu0 %vm143_vm14, %v1061_v11  ;;  %951 = vmatpush3.msk.msra.mxu1 %vm175_vm15, %v1061_v11  ;;  %vm696_vm14 = vcmask 0  }
  0x4e   :  { %402 = vmatmul.mubr.f32.vlgmr.msra.gmra.mxu0 %v62_v38  ;;  %472 = vmatmul.mubr.f32.vlgmr.msra.gmra.mxu1 %v64_v39  ;;  %v335_v43 = vld [vmem:[#allocation2] sm:$0xff]  ;;  %v336_v45 = vld [vmem:[#allocation2 + $0x8] sm:$0xff] }
 0x10e   :  { %v917_v41 = vpop.f32.mrf.mxu0  ;;  %v952_v42 = vpop.f32.mrf.mxu1 }
 0x110   :  { %v918_v44 = vpop.f32.mrf.mxu0  ;;  %v953_v46 = vpop.f32.mrf.mxu1 }
 0x111   :  { %v919_v47 = vadd.f32 %v918_v44, %v917_v41  ;;  %v954_v48 = vadd.f32 %v953_v46, %v952_v42 }
 0x113   :  { %v477_v49 = vadd.f32 %v919_v47, %v335_v43  ;;  %v478_v50 = vadd.f32 %v954_v48, %v336_v45 }
 0x115   :  { %480 = vst.msk [vmem:[#allocation2] sm:$0xff] %vm59_vm0, %v477_v49  ;;  %481 = vst.msk [vmem:[#allocation2 + $0x8] sm:$0xff] %vm59_vm0, %v478_v50 }
 0x11c   :  { %v1268_v58 = vld [vmem:[#allocation2 + $0x8] sm:$0xff]  ;;  %v485_v59 = vld [vmem:[#allocation2] sm:$0xff] }
 0x11d   :  { %v634_v61 = vsub.f32 %v1268_v58, %v630_v53  ;;  %v633_v62 = vsub.f32 %v485_v59, %v629_v54  ;;  %v662_v63 = vsub.f32 %v1268_v58, %v494_v55  ;;  %v661_v0 = vsub.f32 %v485_v59, %v493_v56 }
 0x11e   :  { %v1275_v1 = vmul.f32 %v563_v57, %v485_v59  ;;  %v1279_v8 = vmul.f32 %v557_v60, %v485_v59  ;;  %v1281_v9 = vmul.f32 %v493_v56, %v485_v59  ;;  %v1301_v37 = vmul.f32 %v1261_v52, %v485_v59 }
 0x11f   :  { %v636_v2 = vand.u32 2147483647, %v634_v61  ;;  %v635_v3 = vand.u32 2147483647, %v633_v62  ;;  %v664_v4 = vand.u32 2147483647, %v662_v63  ;;  %v1316_v45 = vmul.f32 %v558_v32, %v1268_v58 }
 0x120   :  { %v663_v5 = vand.u32 2147483647, %v661_v0  ;;  %v571_v12 = vrot.slane %v1275_v1, 1  ;;  %v501_v31 = vrot.slane %v1281_v9, 1  ;;  %v1319_v46 = vmul.f32 %v564_v33, %v1268_v58 }
 0x121   :  { %v640_v6 = vmul.f32 0.5, %v636_v2  ;;  %v882_v7 = vadd.f32 -0.5, %v636_v2  ;;  %vm638_vm4 = vcmp.lt.f32.partialorder %v636_v2, 1.0  ;;  %v639_v10 = vmul.f32 0.5, %v635_v3 }
 0x122   :  { %v668_v11 = vmul.f32 0.5, %v664_v4  ;;  %vm666_vm5 = vcmp.lt.f32.partialorder %v664_v4, 1.0  ;;  %v884_v14 = vadd.f32 -0.5, %v664_v4  ;;  %v667_v15 = vmul.f32 0.5, %v663_v5 }
 0x123   :  { %v642_v13 = vmul.f32 %v640_v6, %v636_v2  ;;  %vm637_vm6 = vcmp.lt.f32.partialorder %v635_v3, 1.0  ;;  %v641_v16 = vmul.f32 %v639_v10, %v635_v3  ;;  %v881_v17 = vadd.f32 -0.5, %v635_v3 }
 0x124   :  { %v670_v18 = vmul.f32 %v668_v11, %v664_v4  ;;  %vm665_vm7 = vcmp.lt.f32.partialorder %v663_v5, 1.0  ;;  %v669_v20 = vmul.f32 %v667_v15, %v663_v5  ;;  %v883_v21 = vadd.f32 -0.5, %v663_v5 }
 0x125   :  { %v646_v19 = vsel %vm638_vm4, %v642_v13, %v882_v7  ;;  %v645_v23 = vsel %vm637_vm6, %v641_v16, %v881_v17  ;;  %v1289_v29 = vmax.f32 %v1279_v8, %v571_v12  ;;  %v1313_v44 = vmax.f32 %v1301_v37, %v501_v31 }
 0x126   :  { %v650_v22 = vrot.slane %v646_v19, 1  ;;  %v656_v24 = vrot.slane %v646_v19, 2  ;;  %v1284_v25 = vsel %vm666_vm5, %v670_v18, %v884_v14  ;;  %v649_v26 = vrot.slane %v645_v23, 1 }
 0x127   :  { %v655_v27 = vrot.slane %v645_v23, 2  ;;  %v1286_v28 = vsel %vm665_vm7, %v669_v20, %v883_v21  ;;  %v678_v36 = vrot.slane %v1284_v25, 4  ;;  %v577_v42 = vsub.f32 %v1279_v8, %v1289_v29 }
 0x128   :  { %v654_v30 = vsel %vm540_vm1, %v650_v22, 0.0  ;;  %v653_v35 = vsel %vm539_vm3, %v649_v26, 0.0  ;;  %v660_v39 = vsel %vm540_vm1, %v656_v24, 0.0  ;;  %v677_v41 = vrot.slane %v1286_v28, 4 }
 0x129   :  { %v713_v34 = vsel %vm709_vm2, %v654_v30, 0.0  ;;  %v710_v38 = vsel %vm709_vm2, %v653_v35, 0.0  ;;  %v659_v40 = vsel %vm539_vm3, %v655_v27, 0.0  ;;  %v585_v43 = vrot.slane %v1289_v29, 7 }
 0x12a   :  { %714 = vadd.xlane.f32.xlu1 %v713_v34  ;;  %711 = vadd.xlane.f32.xlu0 %v710_v38  ;;  %v722_v47 = vsel %vm709_vm2, %v660_v39, 0.0  ;;  %v719_v48 = vsel %vm709_vm2, %v659_v40, 0.0  ;;  %v682_v49 = vsel %vm540_vm1, %v678_v36, 0.0  ;;  %v681_v53 = vsel %vm539_vm3, %v677_v41, 0.0 }
 0x12b   :  { %v589_v50 = vsub.f32 %v1275_v1, %v585_v43  ;;  %v507_v54 = vsub.f32 %v1301_v37, %v1313_v44  ;;  %v515_v56 = vrot.slane %v1313_v44, 7  ;;  %v572_v57 = vrot.slane %v1319_v46, 1 }
 0x12c   :  { %v579_v59 = vmul.f32 1.442695, %v577_v42  ;;  %v1335_v61 = vmul.f32 %v494_v55, %v1268_v58  ;;  %v731_v62 = vsel %vm727_vm8, %v682_v49, 0.0  ;;  %v728_v2 = vsel %vm727_vm8, %v681_v53, 0.0 }
 0x12d   :  { %v591_v60 = vmul.f32 1.442695, %v589_v50  ;;  %v519_v63 = vsub.f32 %v1281_v9, %v515_v56  ;;  %v1340_v0 = vmax.f32 %v1316_v45, %v572_v57  ;;  %v1345_v3 = vmul.f32 %v1259_v51, %v1268_v58 }
 0x12e   :  { %723 = vadd.xlane.f32.xlu1 %v722_v47  ;;  %720 = vadd.xlane.f32.xlu0 %v719_v48  ;;  %v502_v4 = vrot.slane %v1335_v61, 1  ;;  %v509_v5 = vmul.f32 1.442695, %v507_v54  ;;  %v609_v36 = vrot.slane %v1275_v1, 3  ;;  %v615_v38 = vrot.slane %v1279_v8, 2 }
 0x12f   :  { %965 = vpow2.f32 %v591_v60  ;;  %v521_v55 = vmul.f32 1.442695, %v519_v63  ;;  %v578_v6 = vsub.f32 %v1316_v45, %v1340_v0  ;;  %v586_v7 = vrot.slane %v1340_v0, 7 }
 0x130   :  { %967 = vpow2.f32 %v579_v59  ;;  %v1352_v10 = vmax.f32 %v1345_v3, %v502_v4  ;;  %v619_v40 = vsel %vm539_vm3, %v609_v36, %v615_v38  ;;  %v543_v41 = vrot.slane %v1301_v37, 7 }
 0x131   :  { %969 = vpow2.f32 %v521_v55  ;;  %v590_v11 = vsub.f32 %v1319_v46, %v586_v7  ;;  %v581_v13 = vmul.f32 1.442695, %v578_v6  ;;  %v623_v47 = vrot.slane %v619_v40, 6 }
 0x132   :  { %732 = vadd.xlane.f32.xlu1 %v731_v62  ;;  %729 = vadd.xlane.f32.xlu0 %v728_v2  ;;  %v508_v58 = vsub.f32 %v1345_v3, %v1352_v10  ;;  %v516_v12 = vrot.slane %v1352_v10, 7  ;;  %971 = vpow2.f32 %v509_v5  ;;  %v547_v50 = vsel %vm539_vm3, %v1281_v9, %v543_v41 }
 0x133   :  { %v593_v14 = vmul.f32 1.442695, %v590_v11  ;;  %v610_v1 = vrot.slane %v1319_v46, 3  ;;  %v616_v8 = vrot.slane %v1316_v45, 2  ;;  %v551_v37 = vrot.slane %v547_v50, 1 }
 0x134   :  { %v520_v15 = vsub.f32 %v1335_v61, %v516_v12  ;;  %v511_v16 = vmul.f32 1.442695, %v508_v58  ;;  %v544_v57 = vrot.slane %v1345_v3, 7  ;;  %v684_v4 = vrot.slane %v1284_v25, 5 }
 0x135   :  { %973 = vpow2.f32 %v593_v14  ;;  %v683_v11 = vrot.slane %v1286_v28, 5 }
 0x136   :  { %v523_v17 = vmul.f32 1.442695, %v520_v15  ;;  %975 = vpow2.f32 %v581_v13 }
 0x137   :  { %v687_v25 = vsel %vm539_vm3, %v683_v11, 0.0 }
 0x138   :  { %977 = vpow2.f32 %v523_v17 }
 0x139   :  { %979 = vpow2.f32 %v511_v16 }
 0x13c   :  { %v966_v18 = vpop.eup %965 }
 0x13d   :  { %v597_v19 = vrot.slane %v966_v18, 1  ;;  %v968_v20 = vpop.eup %967 }
 0x13e   :  { %v970_v21 = vpop.eup %969 }
 0x13f   :  { %v601_v22 = vadd.f32 %v968_v20, %v597_v19  ;;  %v527_v23 = vrot.slane %v970_v21, 1  ;;  %v972_v24 = vpop.eup %971 }
 0x141   :  { %981 = vlog2.f32 %v601_v22  ;;  %v531_v26 = vadd.f32 %v972_v24, %v527_v23 }
 0x142   :  { %v974_v27 = vpop.eup %973 }
 0x143   :  { %983 = vlog2.f32 %v531_v26  ;;  %v598_v30 = vrot.slane %v974_v27, 1  ;;  %v976_v31 = vpop.eup %975 }
 0x145   :  { %v978_v32 = vpop.eup %977  ;;  %v602_v33 = vadd.f32 %v976_v31, %v598_v30 }
 0x146   :  { %v528_v34 = vrot.slane %v978_v32, 1  ;;  %v980_v35 = vpop.eup %979 }
 0x147   :  { %985 = vlog2.f32 %v602_v33 }
 0x148   :  { %v532_v39 = vadd.f32 %v980_v35, %v528_v34 }
 0x14a   :  { %987 = vlog2.f32 %v532_v39 }
 0x14e   :  { %v982_v42 = vpop.eup %981 }
 0x14f   :  { %v604_v43 = vmul.f32 0.6931472, %v982_v42 }
 0x150   :  { %v984_v48 = vpop.eup %983 }
 0x151   :  { %v607_v49 = vadd.f32 %v604_v43, %v1289_v29  ;;  %v534_v53 = vmul.f32 0.6931472, %v984_v48  ;;  %v620_v29 = vsel %vm540_vm1, %v610_v1, %v616_v8 }
 0x152   :  { %v624_v2 = vrot.slane %v620_v29, 6 }
 0x153   :  { %v627_v54 = vsub.f32 %v607_v49, %v623_v47  ;;  %v537_v56 = vadd.f32 %v534_v53, %v1313_v44  ;;  %v548_v44 = vsel %vm540_vm1, %v1335_v61, %v544_v57 }
 0x154   :  { %v986_v59 = vpop.eup %985  ;;  %v552_v6 = vrot.slane %v548_v44, 1 }
 0x155   :  { %v700_v60 = vsel %vm699_vm9, %v627_v54, 0.0  ;;  %v555_v9 = vsub.f32 %v537_v56, %v551_v37  ;;  %v606_v46 = vmul.f32 0.6931472, %v986_v59 }
 0x156   :  { %701 = vadd.xlane.f32.xlu1 %v700_v60 }
 0x157   :  { %v988_v62 = vpop.eup %987  ;;  %v690_v45 = vsel %vm689_vm10, %v555_v9, 0.0  ;;  %v608_v63 = vadd.f32 %v606_v46, %v1340_v0  ;;  %v688_v0 = vsel %vm540_vm1, %v684_v4, 0.0 }
 0x158   :  { %691 = vadd.xlane.f32.xlu0 %v690_v45  ;;  %v536_v3 = vmul.f32 0.6931472, %v988_v62  ;;  %v740_v61 = vsel %vm727_vm8, %v688_v0, 0.0 }
 0x159   :  { %v628_v5 = vsub.f32 %v608_v63, %v624_v2 }
 0x15a   :  { %v538_v55 = vadd.f32 %v536_v3, %v1352_v10  ;;  %v737_v10 = vsel %vm727_vm8, %v687_v25, 0.0 }
 0x15b   :  { %v703_v7 = vsel %vm699_vm9, %v628_v5, 0.0 }
 0x15c   :  { %704 = vadd.xlane.f32.xlu1 %v703_v7  ;;  %v556_v58 = vsub.f32 %v538_v55, %v552_v6 }
 0x15e   :  { %v693_v12 = vsel %vm689_vm10, %v556_v58, 0.0 }
 0x15f   :  { %694 = vadd.xlane.f32.xlu0 %v693_v12 }
 0x160   :  { %741 = vadd.xlane.f32.xlu1 %v740_v61 }
 0x163   :  { %738 = vadd.xlane.f32.xlu0 %v737_v10 }
 0x1b3   :  { %v715_v13 = vpop.xlane.xlu1 %714  ;;  %v712_v51 = vpop.xlane.xlu0 %711 }
 0x1b4   :  { %718 = vst.msk [vmem:[%s1434_s3 + $0x9] sm:$0x2] %vm716_vm11, %v715_v13  ;;  %717 = vst.msk [vmem:[%s1434_s3 + $0x1] sm:$0x2] %vm716_vm11, %v712_v51 }
 0x1b7   :  { %v724_v28 = vpop.xlane.xlu1 %723  ;;  %v721_v52 = vpop.xlane.xlu0 %720 }
 0x1b8   :  { %726 = vst.msk [vmem:[%s1434_s3 + $0xa] sm:$0x2] %vm716_vm11, %v724_v28  ;;  %725 = vst.msk [vmem:[%s1434_s3 + $0x2] sm:$0x2] %vm716_vm11, %v721_v52 }
 0x1bb   :  { %v733_v14 = vpop.xlane.xlu1 %732  ;;  %v730_v15 = vpop.xlane.xlu0 %729 }
 0x1bc   :  { %736 = vst.msk [vmem:[%s1434_s3 + $0xa] sm:$0x4] %vm734_vm12, %v733_v14  ;;  %735 = vst.msk [vmem:[%s1434_s3 + $0x2] sm:$0x4] %vm734_vm12, %v730_v15 }
 0x1df   :  { %v702_v16 = vpop.xlane.xlu1 %701 }
 0x1e0   :  { %707 = vst.msk [vmem:[%s1434_s3 - $0x3] sm:$0x10] %vm706_vm13, %v702_v16 }
 0x1e1   :  { %v692_v17 = vpop.xlane.xlu0 %691 }
 0x1e2   :  { %697 = vst.msk [vmem:[%s1434_s3] sm:$0x1] %vm696_vm14, %v692_v17 }
 0x1e5   :  { %v705_v18 = vpop.xlane.xlu1 %704 }
 0x1e6   :  { %708 = vst.msk [vmem:[%s1434_s3 + $0x5] sm:$0x10] %vm706_vm13, %v705_v18 }
 0x1e8   :  { %v695_v19 = vpop.xlane.xlu0 %694 }
 0x1e9   :  { %698 = vst.msk [vmem:[%s1434_s3 + $0x8] sm:$0x1] %vm696_vm14, %v695_v19  ;;  %v742_v20 = vpop.xlane.xlu1 %741 }
 0x1ea   :  { %744 = vst.msk [vmem:[%s1434_s3 + $0xb] sm:$0x4] %vm734_vm12, %v742_v20 }
 0x1ec   :  { %v739_v21 = vpop.xlane.xlu0 %738 }
 0x1ed   :  { %743 = vst.msk [vmem:[%s1434_s3 + $0x3] sm:$0x4] %vm734_vm12, %v739_v21 }
 0x1ee   :  { %749 = vsyncpa [#allocation4], 1 }
 0x1ef   :  { %750 = vsyncpa [#allocation6], 1 }

</bundles_post_ra>
